<compile_context>
chip_gen: v7x
topology: tpu7x:2x2x1
jax: 0.10.0
libtpu: 0.0.40
codegen_flags: <defaults>
</compile_context>

<pallas_src>
import jax
import jax.numpy as jnp
from jax.experimental import pallas as pl
from jax.experimental.pallas import tpu as pltpu


def _downsample_kernel(x_ref, w_ref, b_ref, o_ref, acc_ref):
    # x_ref:   (th, tw, K)       one kernel-row slab (kh dim squeezed)
    # w_ref:   (p, K, Nout)      resident weight
    # b_ref:   (1, Nout)         f32 bias
    # o_ref:   (th, tw, Nout)
    # acc_ref: (th*tw, Nout)     f32 accumulator
    kh = pl.program_id(2)

    @pl.when(kh == 0)
    def _init():
        acc_ref[...] = jnp.zeros_like(acc_ref)

    m = acc_ref.shape[0]
    k = x_ref.shape[-1]
    acc_ref[...] += jnp.dot(
        x_ref[...].reshape(m, k), w_ref[kh],
        preferred_element_type=jnp.float32)

    @pl.when(kh == pl.num_programs(2) - 1)
    def _finalize():
        res = acc_ref[...] + b_ref[...]
        o_ref[...] = res.reshape(o_ref.shape).astype(o_ref.dtype)


def downsample(x, weight, bias, patch_size):
    """Pallas equivalent of Downsample.forward.

    x:      (B, H, W, Cin)        NHWC
    weight: (Cout, Cin, p, p)     PyTorch Conv2d weight layout
    bias:   (Cout,)
    returns (B, H//p, W//p, Cout) NHWC
    """
    p = int(patch_size)
    B, H, W, Cin = x.shape
    Cout = weight.shape[0]
    Ho, Wo = H // p, W // p

    # Match PyTorch strided-conv semantics exactly: ragged edges are dropped.
    if (H % p) or (W % p):
        x = x[:, : Ho * p, : Wo * p, :]

    K = p * Cin           # contraction length per kernel row
    R = B * Ho            # flattened (batch, output-row) count

    LANE, SUB = 128, 8
    Nout = ((Cout + LANE - 1) // LANE) * LANE

    # ---- weight / bias glue (tiny): (Cout, Cin, p, p) -> (p, p*Cin, Nout) ----
    # w3[kh, kw*Cin + c, n] = weight[n, c, kh, kw]
    w3 = jnp.transpose(weight, (2, 3, 1, 0)).reshape(p, K, Cout)
    if Nout != Cout:
        w3 = jnp.pad(w3, ((0, 0), (0, 0), (0, Nout - Cout)))
        b2 = jnp.pad(bias, (0, Nout - Cout))
    else:
        b2 = bias
    b2 = b2.reshape(1, Nout).astype(jnp.float32)

    # ---- fused patchify: FREE contiguous reshape, no HBM copy ----
    # x4[b*Ho + ho, kh, wo, kw*Cin + c] == x[b, ho*p + kh, wo*p + kw, c]
    x4 = x.reshape(R, p, Wo, K)

    x_item = jnp.dtype(x.dtype).itemsize
    w_item = jnp.dtype(w3.dtype).itemsize

    # ---- tile sizing under an explicit VMEM budget (v7x-safe) ----
    BUDGET = 16 * 1024 * 1024
    MAX_M = 4096                                   # rows per MXU dot (th*tw) cap
    resident = 2 * p * K * Nout * w_item + 2 * Nout * 4        # weight + bias
    per_col = 2 * K * x_item + 2 * Nout * x_item + Nout * 4    # per output column
    avail = max(BUDGET - resident, SUB * per_col)

    if Wo >= SUB:
        if Wo % SUB == 0:
            tw = Wo
        else:
            # multiple of 8 minimizing total covered columns (least padding waste)
            best_tw, best_cov = SUB, None
            for mlt in range(1, Wo // SUB + 1):
                cand = SUB * mlt
                cov = cand * (-(-Wo // cand))
                if (best_cov is None or cov < best_cov
                        or (cov == best_cov and cand > best_tw)):
                    best_tw, best_cov = cand, cov
            tw = best_tw
        tw_fit = max(SUB, (int(avail // per_col) // SUB) * SUB)
        tw = min(tw, tw_fit)
        th = max(1, min(R, int(avail // (per_col * tw)), MAX_M // tw))
    else:
        tw = Wo     # tiny width: keep th == 1 so no in-kernel relayout is needed
        th = 1

    nrt = pl.cdiv(R, th)
    nwt = pl.cdiv(Wo, tw)
    grid = (nrt, nwt, p)

    cost = pl.CostEstimate(
        flops=2 * (B * Ho * Wo) * (p * p * Cin) * Nout,
        transcendentals=0,
        bytes_accessed=(x4.size * x_item + w3.size * w_item + b2.size * 4
                        + R * Wo * Nout * x_item),
    )

    out = pl.pallas_call(
        _downsample_kernel,
        out_shape=jax.ShapeDtypeStruct((R, Wo, Nout), x.dtype),
        grid_spec=pltpu.PrefetchScalarGridSpec(
            num_scalar_prefetch=0,
            grid=grid,
            in_specs=[
                # th rows x one kernel row kh x tw output columns of patches.
                pl.BlockSpec((th, None, tw, K), lambda i, j, kh: (i, kh, j, 0)),
                # Full weight, constant index -> DMA'd once, stays resident.
                pl.BlockSpec((p, K, Nout), lambda i, j, kh: (0, 0, 0)),
                pl.BlockSpec((1, Nout), lambda i, j, kh: (0, 0)),
            ],
            out_specs=pl.BlockSpec((th, tw, Nout), lambda i, j, kh: (i, j, 0)),
            scratch_shapes=[pltpu.VMEM((th * tw, Nout), jnp.float32)],
        ),
        compiler_params=pltpu.CompilerParams(
            dimension_semantics=("parallel", "parallel", "arbitrary"),
            vmem_limit_bytes=32 * 1024 * 1024,
        ),
        cost_estimate=cost,
    )(x4, w3, b2)

    if Nout != Cout:
        out = out[:, :, :Cout]
    return out.reshape(B, Ho, Wo, Cout)


if __name__ == "__main__":
    # Small shapes consistent with the module's forward:
    # x NHWC, in_embed_dim=4, out_embed_dim=8, patch_size=2
    B, H, W = 2, 16, 16
    Cin, Cout, P = 4, 8, 2

    key = jax.random.PRNGKey(0)
    kx, kw, kb = jax.random.split(key, 3)
    x = jax.random.normal(kx, (B, H, W, Cin), dtype=jnp.float32)
    weight = jax.random.normal(kw, (Cout, Cin, P, P), dtype=jnp.float32) * 0.1
    bias = jax.random.normal(kb, (Cout,), dtype=jnp.float32) * 0.1

    y = downsample(x, weight, bias, P)
    y = jax.block_until_ready(y)

    # Pure-JAX reference (same math as PyTorch Conv2d patch embedding, NHWC).
    Ho, Wo = H // P, W // P
    patches_ref = x.reshape(B, Ho, P, Wo, P, Cin).transpose(0, 1, 3, 2, 4, 5)
    patches_ref = patches_ref.reshape(B, Ho, Wo, P * P * Cin)
    w_ref = jnp.transpose(weight, (2, 3, 1, 0)).reshape(P * P * Cin, Cout)
    y_ref = jnp.einsum("bhwk,kn->bhwn", patches_ref, w_ref) + bias

    assert y.shape == (B, Ho, Wo, Cout), y.shape
    assert jnp.allclose(y, y_ref, atol=1e-5, rtol=1e-5)
    print("KERNEL_OK")
</pallas_src>

<mosaic_0001>
module attributes {stable_mosaic.version = 11 : i64} {
  func.func @_downsample_kernel(%arg0: i32, %arg1: i32, %arg2: i32, %arg3: memref<16x1x8x8xf32, #tpu.memory_space<vmem>>, %arg4: memref<2x8x128xf32, #tpu.memory_space<vmem>>, %arg5: memref<1x128xf32, #tpu.memory_space<vmem>>, %arg6: memref<16x8x128xf32, #tpu.memory_space<vmem>>, %arg7: memref<128x128xf32, #tpu.memory_space<vmem>>) attributes {dimension_semantics = [#tpu.dimension_semantics<parallel>, #tpu.dimension_semantics<parallel>, #tpu.dimension_semantics<arbitrary>], iteration_bounds = array<i64: 1, 1, 2>, scalar_prefetch = 0 : i64, scratch_operands = 1 : i64, tpu.core_type = #tpu.core_type<tc>, window_params = [{transform_indices = @transform_0, window_bounds = array<i64: 16, 1, 8, 8>}, {pipeline_mode = #tpu.pipeline_mode<synchronous>, transform_indices = @transform_1, window_bounds = array<i64: 2, 8, 128>}, {pipeline_mode = #tpu.pipeline_mode<synchronous>, transform_indices = @transform_2, window_bounds = array<i64: 1, 128>}, {transform_indices = @transform_3, window_bounds = array<i64: 16, 8, 128>}]} {
    %c0_i32 = arith.constant 0 : i32
    %0 = arith.cmpi eq, %arg2, %c0_i32 : i32
    %1 = arith.extui %0 : i1 to i32
    %c0_i32_0 = arith.constant 0 : i32
    %2 = arith.cmpi ne, %1, %c0_i32_0 : i32
    scf.if %2 {
      %cst_11 = arith.constant 0.000000e+00 : f32
      %16 = vector.broadcast %cst_11 : f32 to vector<128x128xf32>
      %c0_12 = arith.constant 0 : index
      %c0_13 = arith.constant 0 : index
      %17 = vector.load %arg7[%c0_12, %c0_13] : memref<128x128xf32, #tpu.memory_space<vmem>>, vector<128x128xf32>
      tpu.vector_store %arg7[%c0_12, %c0_13], %16 {strides = array<i32>} : memref<128x128xf32, #tpu.memory_space<vmem>>, vector<128x128xf32>,
    } else {
    }
    %c0 = arith.constant 0 : index
    %c0_1 = arith.constant 0 : index
    %3 = vector.load %arg7[%c0, %c0_1] : memref<128x128xf32, #tpu.memory_space<vmem>>, vector<128x128xf32>
    %c0_2 = arith.constant 0 : index
    %c0_3 = arith.constant 0 : index
    %c0_4 = arith.constant 0 : index
    %c0_5 = arith.constant 0 : index
    %4 = vector.load %arg3[%c0_2, %c0_3, %c0_4, %c0_5] : memref<16x1x8x8xf32, #tpu.memory_space<vmem>>, vector<16x1x8x8xf32>
    %5 = vector.shape_cast %4 : vector<16x1x8x8xf32> to vector<16x8x8xf32>
    %6 = vector.shape_cast %5 : vector<16x8x8xf32> to vector<128x8xf32>
    %7 = arith.index_cast %arg2 : i32 to index
    %c0_6 = arith.constant 0 : index
    %c0_7 = arith.constant 0 : index
    %8 = vector.load %arg4[%7, %c0_6, %c0_7] : memref<2x8x128xf32, #tpu.memory_space<vmem>>, vector<1x8x128xf32>
    %9 = vector.shape_cast %8 : vector<1x8x128xf32> to vector<8x128xf32>
    %cst = arith.constant dense<0.000000e+00> : vector<128x128xf32>
    %10 = tpu.matmul %6, %9, %cst {dimension_numbers = #tpu.dot_dimension_numbers<[1], [0], [0], [1], [0, 0, 1, 1], [], []>} : vector<128x8xf32>, vector<8x128xf32>, vector<128x128xf32> -> vector<128x128xf32>
    %11 = arith.addf %3, %10 : vector<128x128xf32>
    %c0_8 = arith.constant 0 : index
    %c0_9 = arith.constant 0 : index
    %12 = vector.load %arg7[%c0_8, %c0_9] : memref<128x128xf32, #tpu.memory_space<vmem>>, vector<128x128xf32>
    tpu.vector_store %arg7[%c0_8, %c0_9], %11 {strides = array<i32>} : memref<128x128xf32, #tpu.memory_space<vmem>>, vector<128x128xf32>,
    %c1_i32 = arith.constant 1 : i32
    %13 = arith.cmpi eq, %arg2, %c1_i32 : i32
    %14 = arith.extui %13 : i1 to i32
    %c0_i32_10 = arith.constant 0 : i32
    %15 = arith.cmpi ne, %14, %c0_i32_10 : i32
    scf.if %15 {
      %c0_11 = arith.constant 0 : index
      %c0_12 = arith.constant 0 : index
      %16 = vector.load %arg7[%c0_11, %c0_12] : memref<128x128xf32, #tpu.memory_space<vmem>>, vector<128x128xf32>
      %c0_13 = arith.constant 0 : index
      %c0_14 = arith.constant 0 : index
      %17 = vector.load %arg5[%c0_13, %c0_14] : memref<1x128xf32, #tpu.memory_space<vmem>>, vector<1x128xf32>
      %18 = vector.broadcast %17 : vector<1x128xf32> to vector<128x128xf32>
      %19 = arith.addf %16, %18 : vector<128x128xf32>
      %20 = vector.shape_cast %19 : vector<128x128xf32> to vector<16x8x128xf32>
      %c0_15 = arith.constant 0 : index
      %c0_16 = arith.constant 0 : index
      %c0_17 = arith.constant 0 : index
      %21 = vector.load %arg6[%c0_15, %c0_16, %c0_17] : memref<16x8x128xf32, #tpu.memory_space<vmem>>, vector<16x8x128xf32>
      tpu.vector_store %arg6[%c0_15, %c0_16, %c0_17], %20 {strides = array<i32>} : memref<16x8x128xf32, #tpu.memory_space<vmem>>, vector<16x8x128xf32>,
    } else {
    }
    return
  }
  func.func @transform_0(%arg0: i32, %arg1: i32, %arg2: i32) -> (i32, i32, i32, i32) {
    %c0_i32 = arith.constant 0 : i32
    %c0_i32_0 = arith.constant 0 : i32
    return %arg0, %arg2, %arg1, %c0_i32 : i32, i32, i32, i32
  }
  func.func @transform_1(%arg0: i32, %arg1: i32, %arg2: i32) -> (i32, i32, i32) {
    %c0_i32 = arith.constant 0 : i32
    %c0_i32_0 = arith.constant 0 : i32
    %c0_i32_1 = arith.constant 0 : i32
    %c0_i32_2 = arith.constant 0 : i32
    return %c0_i32, %c0_i32_0, %c0_i32_1 : i32, i32, i32
  }
  func.func @transform_2(%arg0: i32, %arg1: i32, %arg2: i32) -> (i32, i32) {
    %c0_i32 = arith.constant 0 : i32
    %c0_i32_0 = arith.constant 0 : i32
    %c0_i32_1 = arith.constant 0 : i32
    return %c0_i32, %c0_i32_0 : i32, i32
  }
  func.func @transform_3(%arg0: i32, %arg1: i32, %arg2: i32) -> (i32, i32, i32) {
    %c0_i32 = arith.constant 0 : i32
    %c0_i32_0 = arith.constant 0 : i32
    return %arg0, %arg1, %c0_i32 : i32, i32, i32
  }
}

</mosaic_0001>

<bundles_post_ra>
// kernel: tpu_custom_call.1
= control target key start
LH: loop header
LB: loop body
LE: loop exit
PB: predicated region body
PF: predicated region fallthrough
CT: control target
= control target key end

     0   :  { %8 = vsyncpa [#allocation5], 0  ;;  %s926_s12 = smov 0   ;;  %s928_s13 = smov 0   ;;  %s1077_s0 = inlined_call_operand.vmem [shape: f32[16,2,8,8], index: 0, kind: input, shape index: {}]   ;;  %s1078_s1 = inlined_call_operand.vmem [shape: f32[2,8,128], index: 1, kind: input, shape index: {}]   ;;  %s1079_s2 = inlined_call_operand.vmem [shape: f32[1,128], index: 2, kind: input, shape index: {}]   ;;  %s1080_s3 = inlined_call_operand.hbm [shape: f32[16,8,128], index: 3, kind: output, shape index: {}]  }
   0x1   :  { %s930_s14 = smov 0   ;;  %s932_s15 = smov 0  }
   0x2   :  { %s934_s16 = smov 0  }
   0x3 LB: > { %s706_s17 = sadd.s32 4294967295, %s900_s16   ;;  %s26_s18 = sadd.s32 1, %s896_s15  ;;  %s900_s16 = sphi %s934_s16, %s14_s16   ;;  %s896_s15 = sphi %s932_s15, %s1085_s15   ;;  %s892_s14 = sphi %s930_s14, %s1084_s14   ;;  %s888_s13 = sphi %s928_s13, %s1083_s13   ;;  %s884_s12 = sphi %s926_s12, %s1082_s12  }
   0x4   : > { %p27_p0 = scmp.ge.s32.totalorder %s26_s18, 2  ;;  %p51_p1 = scmp.ne.s32.totalorder %s888_s13, %s884_s12 }
   0x5   : > { %p52_p2 = scmp.eq.s32.totalorder %s900_s16, 0  ;;  %s44_s20 = sadd.s32 1, %s888_s13 }
   0x6   : > { %s1087_s18 = smov (%p27_p0, %s26_s18), 0  ;;  %p708_p5 = scmp.ge.s32.totalorder %s900_s16, 2 }
   0x7   : > { %p53_p3 = por %p52_p2, %p51_p1  ;;  %s38_s19 = ssub.s32 %s896_s15, %s1087_s18 }
   0x8   : > { %p42_p4 = scmp.eq.s32.totalorder %s38_s19, 0  ;;  %153 = sbr.rel (%p708_p5) target bundleno = 27 (0x1b), region = 24 }
   0xa   : > { %s962_s21 = scalar_select %p42_p4, %s888_s13, %s44_s20  }
   0xf   : > { %156 = sbr.rel (!%p53_p3) target bundleno = 27 (0x1b), region = 28  ;;  %s158_s22 = sand.u32 (%p53_p3), 1, %s888_s13  }
  0x10   : > { %s710_s23 = sshll.u32 (%p53_p3), %s896_s15, 3  ;;  %s709_s24 = sshll.u32 (%p53_p3), %s158_s22, 7 }
  0x11   : > { %s970_s27 = scalar_lea.vmem (%p53_p3), %s1077_s0, %s710_s23  ;;  %s160_s28 = scalar_lea.vmem (%p53_p3), [#allocation3], %s709_s24 }
  0x12   : > { %v224_v0 = vld [vmem:[%s970_s27] sm:$0xff] (%p53_p3)  ;;  %v226_v1 = vld [vmem:[%s970_s27 + $0x10] sm:$0xff] (%p53_p3) }
  0x13   : > { %v228_v2 = vld [vmem:[%s970_s27 + $0x20] sm:$0xff] (%p53_p3)  ;;  %225 = vst [vmem:[%s160_s28] sm:$0xff] (%p53_p3), %v224_v0  ;;  %227 = vst [vmem:[%s160_s28 + $0x8] sm:$0xff] (%p53_p3), %v226_v1  ;;  %v230_v3 = vld [vmem:[%s970_s27 + $0x30] sm:$0xff] (%p53_p3) }
  0x14   : > { %229 = vst [vmem:[%s160_s28 + $0x10] sm:$0xff] (%p53_p3), %v228_v2  ;;  %v232_v4 = vld [vmem:[%s970_s27 + $0x40] sm:$0xff] (%p53_p3)  ;;  %v234_v5 = vld [vmem:[%s970_s27 + $0x50] sm:$0xff] (%p53_p3)  ;;  %231 = vst [vmem:[%s160_s28 + $0x18] sm:$0xff] (%p53_p3), %v230_v3 }
  0x15   : > { %233 = vst [vmem:[%s160_s28 + $0x20] sm:$0xff] (%p53_p3), %v232_v4  ;;  %235 = vst [vmem:[%s160_s28 + $0x28] sm:$0xff] (%p53_p3), %v234_v5  ;;  %v236_v6 = vld [vmem:[%s970_s27 + $0x60] sm:$0xff] (%p53_p3)  ;;  %v238_v7 = vld [vmem:[%s970_s27 + $0x70] sm:$0xff] (%p53_p3) }
  0x16   : > { %v240_v8 = vld [vmem:[%s970_s27 + $0x80] sm:$0xff]  ;;  %237 = vst [vmem:[%s160_s28 + $0x30] sm:$0xff] %v236_v6  ;;  %239 = vst [vmem:[%s160_s28 + $0x38] sm:$0xff] %v238_v7  ;;  %v242_v9 = vld [vmem:[%s970_s27 + $0x90] sm:$0xff] }
  0x17   : > { %241 = vst [vmem:[%s160_s28 + $0x40] sm:$0xff] %v240_v8  ;;  %v244_v10 = vld [vmem:[%s970_s27 + $0xa0] sm:$0xff]  ;;  %v246_v11 = vld [vmem:[%s970_s27 + $0xb0] sm:$0xff]  ;;  %243 = vst [vmem:[%s160_s28 + $0x48] sm:$0xff] %v242_v9 }
  0x18   : > { %245 = vst [vmem:[%s160_s28 + $0x50] sm:$0xff] %v244_v10  ;;  %247 = vst [vmem:[%s160_s28 + $0x58] sm:$0xff] %v246_v11  ;;  %v248_v12 = vld [vmem:[%s970_s27 + $0xc0] sm:$0xff]  ;;  %v250_v13 = vld [vmem:[%s970_s27 + $0xd0] sm:$0xff] }
  0x19   : > { %v252_v14 = vld [vmem:[%s970_s27 + $0xe0] sm:$0xff]  ;;  %249 = vst [vmem:[%s160_s28 + $0x60] sm:$0xff] %v248_v12  ;;  %251 = vst [vmem:[%s160_s28 + $0x68] sm:$0xff] %v250_v13  ;;  %v254_v15 = vld [vmem:[%s970_s27 + $0xf0] sm:$0xff] }
  0x1a   : > { %253 = vst [vmem:[%s160_s28 + $0x70] sm:$0xff] %v252_v14  ;;  %255 = vst [vmem:[%s160_s28 + $0x78] sm:$0xff] %v254_v15 }
  0x1b PF: > { %p711_p6 = scmp.ge.s32.totalorder %s900_s16, 1  ;;  %p260_p7 = scmp.lt.s32.totalorder %s900_s16, 3 }
  0x1d   : > { %p261_p8 = pnand %p711_p6, %p260_p7 }
  0x1e   : > { %s267_s29 = sand.u32 (!%p261_p8), 1, %s884_s12   ;;  %p713_p9 = scmp.ne.s32.totalorder (!%p261_p8), %s892_s14, 0 }
  0x1f   : > { %264 = sbr.rel (%p261_p8) target bundleno = 317 (0x13d), region = 66  ;;  %s712_s30 = sshll.u32 (!%p261_p8), %s267_s29, 7 }
  0x20   : > { %s991_s4 = scalar_lea.vmem (!%p261_p8), [#allocation3], %s712_s30 }
  0x26   : > { %290 = sbr.rel (%p713_p9) target bundleno = 47 (0x2f), region = 74  ;;  %v902_v16 = vmov (!%p713_p9), 0.0  }
  0x27   : > { %291 = vst [vmem:[#allocation2] sm:$0xff] (!%p713_p9), %v902_v16  ;;  %292 = vst [vmem:[#allocation2 + $0x8] sm:$0xff] (!%p713_p9), %v902_v16 }
  0x28   : > { %293 = vst [vmem:[#allocation2 + $0x10] sm:$0xff] (!%p713_p9), %v902_v16  ;;  %294 = vst [vmem:[#allocation2 + $0x18] sm:$0xff] (!%p713_p9), %v902_v16 }
  0x29   : > { %295 = vst [vmem:[#allocation2 + $0x20] sm:$0xff] (!%p713_p9), %v902_v16  ;;  %296 = vst [vmem:[#allocation2 + $0x28] sm:$0xff] (!%p713_p9), %v902_v16 }
  0x2a   : > { %297 = vst [vmem:[#allocation2 + $0x30] sm:$0xff] (!%p713_p9), %v902_v16  ;;  %298 = vst [vmem:[#allocation2 + $0x38] sm:$0xff] (!%p713_p9), %v902_v16 }
  0x2b   : > { %299 = vst [vmem:[#allocation2 + $0x40] sm:$0xff] (!%p713_p9), %v902_v16  ;;  %300 = vst [vmem:[#allocation2 + $0x48] sm:$0xff] (!%p713_p9), %v902_v16 }
  0x2c   : > { %301 = vst [vmem:[#allocation2 + $0x50] sm:$0xff] (!%p713_p9), %v902_v16  ;;  %302 = vst [vmem:[#allocation2 + $0x58] sm:$0xff] (!%p713_p9), %v902_v16 }
  0x2d   : > { %303 = vst [vmem:[#allocation2 + $0x60] sm:$0xff] %v902_v16  ;;  %304 = vst [vmem:[#allocation2 + $0x68] sm:$0xff] %v902_v16 }
  0x2e   : > { %305 = vst [vmem:[#allocation2 + $0x70] sm:$0xff] %v902_v16  ;;  %306 = vst [vmem:[#allocation2 + $0x78] sm:$0xff] %v902_v16 }
  0x2f PF: > { %s714_s5 = sshll.u32 %s892_s14, 3  ;;  %v323_v17 = vld [vmem:[%s991_s4] sm:$0xff]  ;;  %vm342_vm0 = vcmask 64512   ;;  %v324_v20 = vld [vmem:[%s991_s4 + $0x8] sm:$0xff]  ;;  %v325_v22 = vld [vmem:[%s991_s4 + $0x10] sm:$0xff]  ;;  %p731_p10 = scmp.ne.s32.totalorder %s892_s14, 1 }
  0x30   : > { %v331_v18 = vld [vmem:[%s991_s4 + $0x40] sm:$0xff]  ;;  %s340_s8 = scalar_lea.vmem %s1078_s1, %s714_s5  ;;  %756 = vmatprep.mubr.msk.f32.mxu0 %vm342_vm0, %v323_v17  ;;  %v332_v21 = vld [vmem:[%s991_s4 + $0x48] sm:$0xff]  ;;  %v333_v23 = vld [vmem:[%s991_s4 + $0x50] sm:$0xff] }
  0x31   : > { %768 = vmatprep.mubr.msk.f32.mxu1 %vm342_vm0, %v331_v18  ;;  %v341_v19 = vld [vmem:[%s340_s8] sm:$0xff]  ;;  %v326_v24 = vld [vmem:[%s991_s4 + $0x18] sm:$0xff]  ;;  %v328_v28 = vld [vmem:[%s991_s4 + $0x28] sm:$0xff] }
  0x32   : > { %754 = vmatprep.subr.mxu0 %v341_v19  ;;  %780 = vmatprep.subr.mxu1 %v341_v19  ;;  %v334_v25 = vld [vmem:[%s991_s4 + $0x58] sm:$0xff]  ;;  %v327_v26 = vld [vmem:[%s991_s4 + $0x20] sm:$0xff]  ;;  %v336_v29 = vld [vmem:[%s991_s4 + $0x68] sm:$0xff] }
  0x33   : > { %755 = vmatpush3.msra.mxu0 %v341_v19  ;;  %781 = vmatpush3.msra.mxu1 %v341_v19  ;;  %v335_v27 = vld [vmem:[%s991_s4 + $0x60] sm:$0xff]  ;;  %v329_v30 = vld [vmem:[%s991_s4 + $0x30] sm:$0xff]  ;;  %v330_v32 = vld [vmem:[%s991_s4 + $0x38] sm:$0xff] }
  0x34   : > { %757 = vmatmul.mubr.msk.f32.vlgmr.msra.gmra.mrb[0].mxu0 %vm342_vm0, %v324_v20  ;;  %769 = vmatmul.mubr.msk.f32.vlgmr.msra.gmra.mrb[0].mxu1 %vm342_vm0, %v332_v21  ;;  %v337_v31 = vld [vmem:[%s991_s4 + $0x70] sm:$0xff]  ;;  %v338_v33 = vld [vmem:[%s991_s4 + $0x78] sm:$0xff]  ;;  %v308_v34 = vld [vmem:[#allocation2 + $0x8] sm:$0xff] }
  0x35   : > { %759 = vmatprep.mubr.msk.f32.mxu0 %vm342_vm0, %v325_v22  ;;  %771 = vmatprep.mubr.msk.f32.mxu1 %vm342_vm0, %v333_v23  ;;  %v316_v35 = vld [vmem:[#allocation2 + $0x48] sm:$0xff]  ;;  %v307_v36 = vld [vmem:[#allocation2] sm:$0xff]  ;;  %v310_v46 = vld [vmem:[#allocation2 + $0x18] sm:$0xff] }
  0x36   : > { %v315_v37 = vld [vmem:[#allocation2 + $0x40] sm:$0xff]  ;;  %v318_v47 = vld [vmem:[#allocation2 + $0x58] sm:$0xff]  ;;  %v309_v48 = vld [vmem:[#allocation2 + $0x10] sm:$0xff] }
  0x37   : > { %v317_v49 = vld [vmem:[#allocation2 + $0x50] sm:$0xff]  ;;  %v312_v58 = vld [vmem:[#allocation2 + $0x28] sm:$0xff]  ;;  %v311_v60 = vld [vmem:[#allocation2 + $0x20] sm:$0xff] }
  0x38   : > { %760 = vmatmul.mubr.msk.f32.gmra.mrb[2].mxu0 %vm342_vm0, %v326_v24  ;;  %772 = vmatmul.mubr.msk.f32.gmra.mrb[2].mxu1 %vm342_vm0, %v334_v25  ;;  %v320_v59 = vld [vmem:[#allocation2 + $0x68] sm:$0xff]  ;;  %v319_v61 = vld [vmem:[#allocation2 + $0x60] sm:$0xff]  ;;  %v314_v6 = vld [vmem:[#allocation2 + $0x38] sm:$0xff] }
  0x39   : > { %762 = vmatprep.mubr.msk.f32.mxu0 %vm342_vm0, %v327_v26  ;;  %774 = vmatprep.mubr.msk.f32.mxu1 %vm342_vm0, %v335_v27  ;;  %v322_v7 = vld [vmem:[#allocation2 + $0x78] sm:$0xff]  ;;  %v313_v8 = vld [vmem:[#allocation2 + $0x30] sm:$0xff]  ;;  %v732_v19 = vld [vmem:[%s1079_s2] ss:$0 sm:$0xff] (!%p731_p10) }
  0x3a   : > { %v321_v9 = vld [vmem:[#allocation2 + $0x70] sm:$0xff] }
  0x3c   : > { %763 = vmatmul.mubr.msk.f32.gmra.mrb[4].mxu0 %vm342_vm0, %v328_v28  ;;  %775 = vmatmul.mubr.msk.f32.gmra.mrb[4].mxu1 %vm342_vm0, %v336_v29 }
  0x3d   : > { %765 = vmatprep.mubr.msk.f32.mxu0 %vm342_vm0, %v329_v30  ;;  %777 = vmatprep.mubr.msk.f32.mxu1 %vm342_vm0, %v337_v31 }
  0x40   : > { %766 = vmatmul.mubr.msk.f32.gmra.mrb[6].mxu0 %vm342_vm0, %v330_v32  ;;  %778 = vmatmul.mubr.msk.f32.gmra.mrb[6].mxu1 %vm342_vm0, %v338_v33 }
 0x107   : > { %v758_v38 = vpop.f32.mrb[0].mxu0  ;;  %v770_v39 = vpop.f32.mrb[0].mxu1 }
 0x108   : > { %v537_v40 = vadd.f32 %v758_v38, %v308_v34  ;;  %v545_v41 = vadd.f32 %v770_v39, %v316_v35  ;;  %v457_v42 = vpop.f32.mrb[1].mxu0  ;;  %v497_v43 = vpop.f32.mrb[1].mxu1 }
 0x109   : > { %v536_v44 = vadd.f32 %v457_v42, %v307_v36  ;;  %v544_v45 = vadd.f32 %v497_v43, %v315_v37 }
 0x10a   : > { %553 = vst [vmem:[#allocation2 + $0x8] sm:$0xff] %v537_v40  ;;  %561 = vst [vmem:[#allocation2 + $0x48] sm:$0xff] %v545_v41 }
 0x10b   : > { %552 = vst [vmem:[#allocation2] sm:$0xff] %v536_v44  ;;  %560 = vst [vmem:[#allocation2 + $0x40] sm:$0xff] %v544_v45  ;;  %v761_v50 = vpop.f32.mrb[2].mxu0  ;;  %v773_v51 = vpop.f32.mrb[2].mxu1 }
 0x10c   : > { %v539_v52 = vadd.f32 %v761_v50, %v310_v46  ;;  %v547_v53 = vadd.f32 %v773_v51, %v318_v47  ;;  %v467_v54 = vpop.f32.mrb[3].mxu0  ;;  %v507_v55 = vpop.f32.mrb[3].mxu1 }
 0x10d   : > { %v538_v56 = vadd.f32 %v467_v54, %v309_v48  ;;  %v546_v57 = vadd.f32 %v507_v55, %v317_v49 }
 0x10e   : > { %555 = vst [vmem:[#allocation2 + $0x18] sm:$0xff] %v539_v52  ;;  %563 = vst [vmem:[#allocation2 + $0x58] sm:$0xff] %v547_v53 }
 0x10f   : > { %554 = vst [vmem:[#allocation2 + $0x10] sm:$0xff] %v538_v56  ;;  %562 = vst [vmem:[#allocation2 + $0x50] sm:$0xff] %v546_v57  ;;  %v764_v62 = vpop.f32.mrb[4].mxu0  ;;  %v776_v63 = vpop.f32.mrb[4].mxu1 }
 0x110   : > { %v541_v0 = vadd.f32 %v764_v62, %v312_v58  ;;  %v549_v1 = vadd.f32 %v776_v63, %v320_v59  ;;  %v477_v2 = vpop.f32.mrb[5].mxu0  ;;  %v517_v3 = vpop.f32.mrb[5].mxu1 }
 0x111   : > { %v540_v4 = vadd.f32 %v477_v2, %v311_v60  ;;  %v548_v5 = vadd.f32 %v517_v3, %v319_v61  ;;  %571 = sbr.rel (%p731_p10) target bundleno = 291 (0x123), region = 78  ;;  %v573_v20 = vld [vmem:[#allocation2 + $0x8] sm:$0xff] (!%p731_p10) }
 0x112   : > { %557 = vst [vmem:[#allocation2 + $0x28] sm:$0xff] %v541_v0  ;;  %565 = vst [vmem:[#allocation2 + $0x68] sm:$0xff] %v549_v1  ;;  %v572_v18 = vld [vmem:[#allocation2] sm:$0xff] (!%p731_p10)  ;;  %v596_v22 = vadd.f32 (!%p731_p10), %v732_v19, %v573_v20  ;;  %v581_v36 = vld [vmem:[#allocation2 + $0x48] sm:$0xff] (!%p731_p10) }
 0x113   : > { %556 = vst [vmem:[#allocation2 + $0x20] sm:$0xff] %v540_v4  ;;  %564 = vst [vmem:[#allocation2 + $0x60] sm:$0xff] %v548_v5  ;;  %v767_v10 = vpop.f32.mrb[6].mxu0  ;;  %v779_v11 = vpop.f32.mrb[6].mxu1  ;;  %v595_v21 = vadd.f32 (!%p731_p10), %v732_v19, %v572_v18  ;;  %v580_v35 = vld [vmem:[#allocation2 + $0x40] sm:$0xff] (!%p731_p10)  ;;  %v604_v39 = vadd.f32 (!%p731_p10), %v732_v19, %v581_v36 }
 0x114   : > { %v543_v12 = vadd.f32 %v767_v10, %v314_v6  ;;  %v551_v13 = vadd.f32 %v779_v11, %v322_v7  ;;  %v487_v14 = vpop.f32.mrb[7].mxu0  ;;  %v527_v15 = vpop.f32.mrb[7].mxu1  ;;  %612 = vst [vmem:[#allocation4 + $0x8] sm:$0xff] (!%p731_p10), %v596_v22  ;;  %v603_v38 = vadd.f32 (!%p731_p10), %v732_v19, %v580_v35 }
 0x115   : > { %v542_v16 = vadd.f32 %v487_v14, %v313_v8  ;;  %v550_v17 = vadd.f32 %v527_v15, %v321_v9  ;;  %v575_v24 = vld [vmem:[#allocation2 + $0x18] sm:$0xff] (!%p731_p10)  ;;  %611 = vst [vmem:[#allocation4] sm:$0xff] (!%p731_p10), %v595_v21  ;;  %620 = vst [vmem:[#allocation4 + $0x48] sm:$0xff] (!%p731_p10), %v604_v39 }
 0x116   : > { %559 = vst [vmem:[#allocation2 + $0x38] sm:$0xff] %v543_v12  ;;  %567 = vst [vmem:[#allocation2 + $0x78] sm:$0xff] %v551_v13  ;;  %v574_v23 = vld [vmem:[#allocation2 + $0x10] sm:$0xff] (!%p731_p10)  ;;  %v598_v27 = vadd.f32 (!%p731_p10), %v732_v19, %v575_v24  ;;  %v583_v41 = vld [vmem:[#allocation2 + $0x58] sm:$0xff] (!%p731_p10) }
 0x117   : > { %558 = vst [vmem:[#allocation2 + $0x30] sm:$0xff] %v542_v16  ;;  %566 = vst [vmem:[#allocation2 + $0x70] sm:$0xff] %v550_v17  ;;  %v597_v26 = vadd.f32 (!%p731_p10), %v732_v19, %v574_v23  ;;  %v582_v37 = vld [vmem:[#allocation2 + $0x50] sm:$0xff] (!%p731_p10)  ;;  %v606_v44 = vadd.f32 (!%p731_p10), %v732_v19, %v583_v41 }
 0x118   : > { %614 = vst [vmem:[#allocation4 + $0x18] sm:$0xff] %v598_v27  ;;  %v605_v40 = vadd.f32 %v732_v19, %v582_v37  ;;  %619 = vst [vmem:[#allocation4 + $0x40] sm:$0xff] %v603_v38 }
 0x119   : > { %v577_v29 = vld [vmem:[#allocation2 + $0x28] sm:$0xff]  ;;  %613 = vst [vmem:[#allocation4 + $0x10] sm:$0xff] %v597_v26  ;;  %622 = vst [vmem:[#allocation4 + $0x58] sm:$0xff] %v606_v44 }
 0x11a   : > { %v576_v25 = vld [vmem:[#allocation2 + $0x20] sm:$0xff]  ;;  %v600_v32 = vadd.f32 %v732_v19, %v577_v29  ;;  %v585_v43 = vld [vmem:[#allocation2 + $0x68] sm:$0xff]  ;;  %621 = vst [vmem:[#allocation4 + $0x50] sm:$0xff] %v605_v40 }
 0x11b   : > { %v599_v28 = vadd.f32 %v732_v19, %v576_v25  ;;  %v584_v42 = vld [vmem:[#allocation2 + $0x60] sm:$0xff]  ;;  %v608_v46 = vadd.f32 %v732_v19, %v585_v43 }
 0x11c   : > { %616 = vst [vmem:[#allocation4 + $0x28] sm:$0xff] %v600_v32  ;;  %v607_v45 = vadd.f32 %v732_v19, %v584_v42 }
 0x11d   : > { %v579_v31 = vld [vmem:[#allocation2 + $0x38] sm:$0xff]  ;;  %615 = vst [vmem:[#allocation4 + $0x20] sm:$0xff] %v599_v28  ;;  %624 = vst [vmem:[#allocation4 + $0x68] sm:$0xff] %v608_v46 }
 0x11e   : > { %v578_v30 = vld [vmem:[#allocation2 + $0x30] sm:$0xff]  ;;  %v602_v34 = vadd.f32 %v732_v19, %v579_v31  ;;  %v587_v48 = vld [vmem:[#allocation2 + $0x78] sm:$0xff]  ;;  %623 = vst [vmem:[#allocation4 + $0x60] sm:$0xff] %v607_v45 }
 0x11f   : > { %v601_v33 = vadd.f32 %v732_v19, %v578_v30  ;;  %v586_v47 = vld [vmem:[#allocation2 + $0x70] sm:$0xff]  ;;  %v610_v50 = vadd.f32 %v732_v19, %v587_v48 }
 0x120   : > { %618 = vst [vmem:[#allocation4 + $0x38] sm:$0xff] %v602_v34  ;;  %v609_v49 = vadd.f32 %v732_v19, %v586_v47 }
 0x121   : > { %617 = vst [vmem:[#allocation4 + $0x30] sm:$0xff] %v601_v33  ;;  %626 = vst [vmem:[#allocation4 + $0x78] sm:$0xff] %v610_v50 }
 0x122   : > { %625 = vst [vmem:[#allocation4 + $0x70] sm:$0xff] %v609_v49 }
 0x123 PF: > { %p1036_p11 = scmp.eq.s32.totalorder %s706_s17, 1  ;;  %s903_s12 = smov [#allocation4]  }
 0x124   : > { %s637_s14 = sshll.u32 %s903_s12, 4  ;;  %s638_s14 = int_to_ptr.vmem [resolvable:$true] %s637_s14 }
 0x125   : > { %s832_s19 = scalar_lea.vmem %s638_s14, 2048  ;;  %p839_p1 = scmp.lt.s32.totalorder %s638_s14, %s638_s14 }
 0x126   : > { %p833_p12 = scmp.ne.s32.totalorder %s638_s14, %s832_s19  ;;  %p840_p2 = scmp.lt.s32.totalorder %s832_s19, %s832_s19 }
 0x128   : > { %p834_p13 = pnand %p833_p12, %p1036_p11  ;;  %p841_p3 = por %p840_p2, %p839_p1 }
 0x12a   : > { %p835_p0 = pneg %p834_p13 }
 0x12c   : > { %p842_p4 = pnand %p841_p3, %p835_p0 }
 0x12e   : > { %845 = shalt.err (!%p842_p4)
}
 0x12f   : > { %s846_s17 = scalar_lea.hbm %s1080_s3, 2048 }
 0x130   : > { %p847_p5 = scmp.ne.s32.totalorder %s1080_s3, %s846_s17  ;;  %p852_p8 = scmp.lt.u32.totalorder %s846_s17, %s1080_s3 }
 0x132   : > { %p848_p6 = pnand %p847_p5, %p1036_p11 }
 0x134   : > { %p849_p7 = pneg %p848_p6 }
 0x136   : > { %p854_p9 = pnand %p852_p8, %p849_p7 }
 0x138   : > { %857 = shalt.err (!%p854_p9)
}
 0x139   : > { %s904_s27 = smov 128   ;;  %s905_s28 = smov 8  }
 0x13a   : > { %783 = dma.vmem_to_hbm [thread:$0]  (%p1036_p11), %s638_s14, 2048, %s1080_s3, [#allocation5], %s904_s27, %s904_s27, %s905_s28  }
 0x13b   : > { %879 = dma.done.wait (%p1036_p11), [#allocation5], 2048  }
 0x13c   : > { %881 = vsyncadd (%p1036_p11), [#allocation5], 4294965248 }
 0x13d PF: > { %s14_s16 = sadd.s32 1, %s900_s16   ;;  %s1082_s12 = smov %s888_s13 }
 0x13e   : > { %p11_p10 = scmp.ge.s32.totalorder %s14_s16, 4   ;;  %s1083_s13 = smov %s962_s21 }
 0x13f   : > { %s1084_s14 = smov %s896_s15  ;;  %s1085_s15 = smov %s1087_s18 }
 0x140   :  { %13 = sbr.rel (!%p11_p10) target bundleno = 3 (0x3), region = 112 }
 0x147   :  { %653 = vsyncpa [#allocation5], 1 }
 0x148   :  { %655 = vsyncpa [#allocation5 + $0x1], 1 }

</bundles_post_ra>
